<compile_context>
chip_gen: v7x
topology: tpu7x:2x2x1
jax: 0.10.0
libtpu: 0.0.40
codegen_flags: <defaults>
</compile_context>

<pallas_src>
import math

import numpy as np
import jax
import jax.numpy as jnp
from jax.experimental import pallas as pl
from jax.experimental.pallas import tpu as pltpu

# --- model hyper-parameters (consistent with the module) -------------------
LAYERS = 2          # number of ResNet blocks
INPUT_SIZE = 5      # fixed by the forward pass (g has 5 entries)
OUTPUT_SIZE = 8
HIDDEN = 32
FEAT = 8            # feature_size

_EPS_LN = 1e-5
_LEAKY_SLOPE = 0.01

# --- packed-parameter slab layout (static Python ints) ----------------------
N_ENC = 8                         # 8 encoder column blocks of width FEAT
ZW = N_ENC * FEAT                 # 64
ENC_IN = 64                       # x (39) zero-padded to 64 (aligned K)

# column blocks of the fused encoder output z (width ZW)
C_H, C_DIM, C_XI, C_TJ, C_CA, C_CB, C_FAB, C_TF = (FEAT * i for i in range(N_ENC))

ROW_WENC = 0                                  # (ENC_IN, ZW) fused encoder weight
ROW_WG = ROW_WENC + ENC_IN                    # (ZW, HIDDEN) g + resnet-input fusion
ROW_WHEAD = ROW_WG + ZW                       # (ZW, FEAT)   E / nu / Ga heads
ROW_BLK = ROW_WHEAD + ZW                      # LAYERS * 2 * (HIDDEN, HIDDEN)
ROW_VEC = ROW_BLK + LAYERS * 2 * HIDDEN       # small row-vectors below
VEC_BENC = ROW_VEC + 0                        # b_enc (64)
VEC_WINIT = ROW_VEC + 1                       # w_init tiled 8x (64)
VEC_BINIT = ROW_VEC + 2                       # b_init tiled 8x (64)
VEC_BRN0 = ROW_VEC + 3                        # b_rn0 (32)
VEC_LAYER0 = ROW_VEC + 4                      # per layer: b1, b2, ln_gamma, ln_beta
VEC_WFOLD = VEC_LAYER0 + 4 * LAYERS           # (w_rnf @ w_read^T)^T (32)
VEC_BHEAD = VEC_WFOLD + 1                     # head biases: by, bp, bsh
VEC_MISC = VEC_BHEAD + 1                      # b_fold, w_scale, b_scale
N_ROWS = ((VEC_MISC + 1 + 7) // 8) * 8        # 336


# --------------------------- in-kernel helpers ------------------------------
def _lrelu(v):
    return jnp.where(v > 0.0, v, _LEAKY_SLOPE * v)


def _softplus(v):
    # numerically-safe softplus (PyTorch threshold semantics, beta=1)
    return jnp.where(v > 20.0, v, jnp.log(1.0 + jnp.exp(jnp.minimum(v, 20.0))))


def _layer_norm(v, gamma, beta):
    mu = jnp.mean(v, axis=-1, keepdims=True)
    var = jnp.mean((v - mu) * (v - mu), axis=-1, keepdims=True)
    return (v - mu) * jax.lax.rsqrt(var + _EPS_LN) * gamma + beta


# ------------------------------- the kernel ---------------------------------
def pinohi_kernel(x_ref, p_ref, out_ref):
    xv = x_ref[...]                                       # (1, ENC_IN)
    f_val = xv[:, 0:1]                                    # scaled load F

    # ---- all 8 feature encoders fused into ONE MXU matmul ----
    z = jnp.dot(xv, p_ref[ROW_WENC:ROW_WENC + ENC_IN, :],
                preferred_element_type=jnp.float32)
    z = _lrelu(z + p_ref[VEC_BENC:VEC_BENC + 1, :])       # (1, 64)

    # h = lrelu(initial(F)), replicated into every 8-lane block (one VPU
    # broadcast mul-add); Wg zeroes the non-z blocks, so the replication is safe.
    hrep = _lrelu(f_val * p_ref[VEC_WINIT:VEC_WINIT + 1, :]
                  + p_ref[VEC_BINIT:VEC_BINIT + 1, :])    # (1, 64)

    # ---- g = z_mfg @ h fused with resnet input Linear(5, HIDDEN): ONE matmul ----
    a = (jnp.dot(z * hrep, p_ref[ROW_WG:ROW_WG + ZW, 0:HIDDEN],
                 preferred_element_type=jnp.float32)
         + p_ref[VEC_BRN0:VEC_BRN0 + 1, 0:HIDDEN])        # (1, HIDDEN)

    # ---- E / nu / Ga heads: ONE matmul + ONE softplus ----
    head_raw = (jnp.dot(z, p_ref[ROW_WHEAD:ROW_WHEAD + ZW, 0:FEAT],
                        preferred_element_type=jnp.float32)
                + p_ref[VEC_BHEAD:VEC_BHEAD + 1, 0:FEAT])
    sp = _softplus(head_raw)
    E = jnp.clip(sp[:, 0:1], 3.25, 9.75)
    nu = jnp.clip(sp[:, 1:2], 0.17, 0.51)
    Ga = jnp.clip(sp[:, 2:3], 2.82, 8.46)

    # ---- ResNet MLP: Linear(5,H) -> [LReLU, block]*L -> LReLU -> Linear(H,OUT) ----
    for l in range(LAYERS):                               # LAYERS=2: static unroll
        a_in = _lrelu(a)
        base = ROW_BLK + l * 2 * HIDDEN
        vb = VEC_LAYER0 + 4 * l
        t = _lrelu(jnp.dot(a_in, p_ref[base:base + HIDDEN, 0:HIDDEN],
                           preferred_element_type=jnp.float32)
                   + p_ref[vb:vb + 1, 0:HIDDEN])
        t = (jnp.dot(t, p_ref[base + HIDDEN:base + 2 * HIDDEN, 0:HIDDEN],
                     preferred_element_type=jnp.float32)
             + p_ref[vb + 1:vb + 2, 0:HIDDEN])
        t = _layer_norm(t, p_ref[vb + 2:vb + 3, 0:HIDDEN],
                        p_ref[vb + 3:vb + 4, 0:HIDDEN])
        a = t + a_in                                      # residual
    a = _lrelu(a)

    # readout Linear(OUT,1) folded host-side into the final resnet Linear
    misc = p_ref[VEC_MISC:VEC_MISC + 1, 0:FEAT]           # b_fold, w_scale, b_scale
    dfdt_nn = (jnp.sum(a * p_ref[VEC_WFOLD:VEC_WFOLD + 1, 0:HIDDEN],
                       axis=-1, keepdims=True) + misc[:, 0:1])

    # ---- AnalyticalStiffness (elementwise on (1,1) values) ----
    ta = xv[:, 14:15]
    bb = xv[:, 15:16]
    cc = xv[:, 16:17]
    tt = xv[:, 17:18]
    ll = xv[:, 18:19]

    fp = jnp.where(f_val <= 0.0, 0.001, f_val)
    Ee = 10000.0 * E
    Gaa = 100.0 * Ga
    one_m_nu2 = 1.0 - nu * nu
    tt3 = tt * tt * tt
    # The N / B1 / int_wdx chain is ill-conditioned (catastrophic cancellation),
    # so it keeps exact divides / sqrt; only benign multiplicative factors use
    # the EUP approximate reciprocal.
    D1 = Ee * tt3 * bb / (12.0 * one_m_nu2)
    mu1 = jnp.sqrt(fp / D1)
    mu2 = mu1 * 0.35355339059327379            # D2 = 8*D1  ->  mu2 = mu1/sqrt(8)
    e1 = jnp.exp(mu1 * ll)                     # only 2 exp calls total
    e2 = jnp.exp(mu2 * cc)
    ie1 = 1.0 / e1
    ie2 = 1.0 / e2
    CL = 0.5 * (e1 + ie1)
    SL = 0.5 * (e1 - ie1)
    CC = 0.5 * (e2 + ie2)
    SC = 0.5 * (e2 - ie2)
    mix = mu2 * CL * CC + mu1 * SL * SC
    N = mu1 * CL * SC + mu2 * SL * CC - mu1 * (ll + cc) * mix
    B1 = (tt + ta) * (mix - mu2 * CC) / (2.0 * N)
    A1 = -(tt + ta) * 0.5 - mu1 * (ll + cc) * B1
    A1sq = A1 * A1
    B1sq = B1 * B1
    sinh2 = 2.0 * SL * CL                      # sinh(2*mu1*L)   (double angle)
    cosh2m1 = 2.0 * SL * SL                    # cosh(2*mu1*L)-1 (double angle)
    mu1_3 = mu1 * mu1 * mu1
    int_wdx = 0.25 * mu1_3 * (2.0 * mu1 * ll * (A1sq - B1sq)
                              + (A1sq + B1sq) * sinh2
                              + 2.0 * A1 * B1 * cosh2m1)
    inv_Ee = pl.reciprocal(Ee, approx=True)
    inv_bt = pl.reciprocal(bb * tt, approx=True)
    sig = fp * inv_bt
    U1 = 0.5 * inv_Ee * bb * (Ee * Ee * tt3 * int_wdx
                              / (12.0 * one_m_nu2 * one_m_nu2)
                              + ll * tt * sig * sig)
    U2 = fp * fp * cc * (inv_Ee * inv_bt * (1.0 / 3.0))
    Ua = fp * fp * ta * 0.25 * pl.reciprocal(Gaa * bb * cc, approx=True)
    k = (fp * fp * pl.reciprocal(2.0 * Ua + 4.0 * (U1 + U2), approx=True)
         * (1.0 / 1200.0))
    dfdt_ana = k * misc[:, 1:2] + misc[:, 2:3]            # scaling: Linear(1,1)

    out_ref[...] = dfdt_nn + dfdt_ana                     # (1, 1)


# ------------------------------ wrapper / glue -------------------------------
def pinohi_forward(x, packed):
    """x: (1, 39) float32; packed: (N_ROWS, ZW) float32 parameter slab."""
    x_pad = jnp.zeros((1, ENC_IN), jnp.float32).at[:, :x.shape[1]].set(
        x.astype(jnp.float32))
    vmem = pl.BlockSpec(memory_space=pltpu.MemorySpace.VMEM)
    out = pl.pallas_call(
        pinohi_kernel,
        out_shape=jax.ShapeDtypeStruct((1, 1), jnp.float32),
        in_specs=[vmem, vmem],
        out_specs=vmem,
    )(x_pad, packed)
    return out.reshape(-1)      # shape (1,), matching the PyTorch module output


# --------------------------- host-side parameter pack ------------------------
def pack_params(p):
    """Pack every parameter into one lane-dense f32 slab -> a single DMA."""
    S = np.zeros((N_ROWS, ZW), np.float32)

    # fused encoder weight: z = lrelu(x_pad @ W_enc + b_enc)
    enc = [
        (9, 14, C_DIM, "w_dim", "b_dim"),     # dim_fc  : x[9:14]
        (19, 26, C_XI, "w_mfg", "b_mfg"),     # mfg_fc  : x[19:26]
        (26, 30, C_TJ, "w_ctJ", "b_ctJ"),     # conv_tempJ
        (30, 34, C_CA, "w_cA", "b_cA"),       # conv_caA
        (34, 38, C_CB, "w_cB", "b_cB"),       # conv_caB
        (1, 5, C_FAB, "w_fab", "b_fab"),      # fab_fc  : x[1:5]
        (5, 9, C_TF, "w_ctF", "b_ctF"),       # conv_tempF
    ]
    for lo, hi, col, wk, bk in enc:
        S[ROW_WENC + lo:ROW_WENC + hi, col:col + FEAT] = np.asarray(p[wk])
        S[VEC_BENC, col:col + FEAT] = np.asarray(p[bk])[0]

    # h = lrelu(x0*w_init + b_init), replicated into every 8-lane block
    S[VEC_WINIT, :] = np.tile(np.asarray(p["w_init"])[0], N_ENC)
    S[VEC_BINIT, :] = np.tile(np.asarray(p["b_init"])[0], N_ENC)

    # Wg: fuses g = z_mfg @ h with the resnet input Linear(5, HIDDEN)
    w_rn0 = np.asarray(p["w_rn0"])                        # (5, HIDDEN)
    for j, col in enumerate((C_DIM, C_XI, C_TJ, C_CA, C_CB)):
        S[ROW_WG + col:ROW_WG + col + FEAT, :HIDDEN] = w_rn0[j][None, :]
    S[VEC_BRN0, :HIDDEN] = np.asarray(p["b_rn0"])[0]

    # heads: youngs (col 0), poisson (col 1), shear (col 2)
    S[ROW_WHEAD + C_FAB:ROW_WHEAD + C_FAB + FEAT, 0] = np.asarray(p["wy_fab"])[0]
    S[ROW_WHEAD + C_TF:ROW_WHEAD + C_TF + FEAT, 0] = np.asarray(p["wy_tmp"])[0]
    S[ROW_WHEAD + C_FAB:ROW_WHEAD + C_FAB + FEAT, 1] = np.asarray(p["wp_fab"])[0]
    S[ROW_WHEAD + C_TF:ROW_WHEAD + C_TF + FEAT, 1] = np.asarray(p["wp_tmp"])[0]
    wsh = np.asarray(p["wsh"])                            # rows: xi, tempJ, caA, caB
    for j, col in enumerate((C_XI, C_TJ, C_CA, C_CB)):
        S[ROW_WHEAD + col:ROW_WHEAD + col + FEAT, 2] = wsh[j]
    S[VEC_BHEAD, 0] = float(np.asarray(p["by"])[0, 0])
    S[VEC_BHEAD, 1] = float(np.asarray(p["bp"])[0, 0])
    S[VEC_BHEAD, 2] = float(np.asarray(p["bsh"])[0, 0])

    # resnet blocks
    for l in range(LAYERS):
        base = ROW_BLK + l * 2 * HIDDEN
        S[base:base + HIDDEN, :HIDDEN] = np.asarray(p["w_blk1"])[l]
        S[base + HIDDEN:base + 2 * HIDDEN, :HIDDEN] = np.asarray(p["w_blk2"])[l]
        vb = VEC_LAYER0 + 4 * l
        S[vb + 0, :HIDDEN] = np.asarray(p["b_blk1"])[l, 0]
        S[vb + 1, :HIDDEN] = np.asarray(p["b_blk2"])[l, 0]
        S[vb + 2, :HIDDEN] = np.asarray(p["g_ln"])[l, 0]
        S[vb + 3, :HIDDEN] = np.asarray(p["beta_ln"])[l, 0]

    # readout Linear(OUT,1) folded into the final resnet Linear(H,OUT)
    w_read = np.asarray(p["w_read"])                      # (1, OUT)
    w_fold = np.asarray(p["w_rnf"]) @ w_read.T            # (H, 1)
    b_fold = float((np.asarray(p["b_rnf"]) @ w_read.T
                    + np.asarray(p["b_read"])).item())
    S[VEC_WFOLD, :HIDDEN] = w_fold[:, 0]
    S[VEC_MISC, 0] = b_fold
    S[VEC_MISC, 1] = float(np.asarray(p["w_scale"])[0, 0])
    S[VEC_MISC, 2] = float(np.asarray(p["b_scale"])[0, 0])
    return jnp.asarray(S)


# --------------------------- example parameter init --------------------------
def _uinit(key, shape, fan_in):
    bound = 1.0 / math.sqrt(fan_in)
    return jax.random.uniform(key, shape, jnp.float32, -bound, bound)


def make_params(seed=42):
    keys = iter(jax.random.split(jax.random.PRNGKey(seed), 64))
    p = {}
    p["w_init"] = _uinit(next(keys), (1, FEAT), 1)
    p["b_init"] = _uinit(next(keys), (1, FEAT), 1)
    p["w_fab"] = _uinit(next(keys), (4, FEAT), 4)
    p["b_fab"] = _uinit(next(keys), (1, FEAT), 4)
    p["w_dim"] = _uinit(next(keys), (5, FEAT), 5)
    p["b_dim"] = _uinit(next(keys), (1, FEAT), 5)
    p["w_mfg"] = _uinit(next(keys), (7, FEAT), 7)
    p["b_mfg"] = _uinit(next(keys), (1, FEAT), 7)
    for name in ("ctF", "ctJ", "cA", "cB"):   # Conv2d(1,F,2) == Linear(4,F)
        p[f"w_{name}"] = _uinit(next(keys), (4, FEAT), 4)
        p[f"b_{name}"] = _uinit(next(keys), (1, FEAT), 4)
    p["wy_fab"] = _uinit(next(keys), (1, FEAT), 2 * FEAT)
    p["wy_tmp"] = _uinit(next(keys), (1, FEAT), 2 * FEAT)
    p["by"] = _uinit(next(keys), (1, 1), 2 * FEAT)
    p["wp_fab"] = _uinit(next(keys), (1, FEAT), 2 * FEAT)
    p["wp_tmp"] = _uinit(next(keys), (1, FEAT), 2 * FEAT)
    p["bp"] = _uinit(next(keys), (1, 1), 2 * FEAT)
    p["wsh"] = _uinit(next(keys), (4, FEAT), 4 * FEAT)
    p["bsh"] = _uinit(next(keys), (1, 1), 4 * FEAT)
    p["w_read"] = _uinit(next(keys), (1, OUTPUT_SIZE), OUTPUT_SIZE)
    p["b_read"] = _uinit(next(keys), (1, 1), OUTPUT_SIZE)
    p["w_scale"] = _uinit(next(keys), (1, 1), 1)
    p["b_scale"] = _uinit(next(keys), (1, 1), 1)
    p["w_rn0"] = _uinit(next(keys), (INPUT_SIZE, HIDDEN), INPUT_SIZE)
    p["b_rn0"] = _uinit(next(keys), (1, HIDDEN), INPUT_SIZE)
    p["w_blk1"] = _uinit(next(keys), (LAYERS, HIDDEN, HIDDEN), HIDDEN)
    p["b_blk1"] = _uinit(next(keys), (LAYERS, 1, HIDDEN), HIDDEN)
    p["w_blk2"] = _uinit(next(keys), (LAYERS, HIDDEN, HIDDEN), HIDDEN)
    p["b_blk2"] = _uinit(next(keys), (LAYERS, 1, HIDDEN), HIDDEN)
    p["g_ln"] = jnp.ones((LAYERS, 1, HIDDEN), jnp.float32)
    p["beta_ln"] = jnp.zeros((LAYERS, 1, HIDDEN), jnp.float32)
    p["w_rnf"] = _uinit(next(keys), (HIDDEN, OUTPUT_SIZE), HIDDEN)
    p["b_rnf"] = _uinit(next(keys), (1, OUTPUT_SIZE), HIDDEN)
    return p


if __name__ == "__main__":
    # Deterministic example input: a (1, 39) feature row.
    key = jax.random.PRNGKey(0)
    x = 0.5 * jax.random.normal(key, (1, 39), jnp.float32)
    # physically sensible values where the analytic formula needs them
    x = x.at[0, 0].set(0.5)     # scaled load F (> 0)
    x = x.at[0, 14].set(0.2)    # ta  (adhesive thickness)
    x = x.at[0, 15].set(5.0)    # b   (width)
    x = x.at[0, 16].set(2.0)    # c   (overlap half-length)
    x = x.at[0, 17].set(1.0)    # tt  (adherend thickness)
    x = x.at[0, 18].set(10.0)   # L   (free length)
    x = x.at[0, 38].set(0.0)    # placeholder

    params = make_params(seed=42)
    packed = pack_params(params)

    out = pinohi_forward(x, packed)
    out = jax.block_until_ready(out)
    assert out.shape == (1,)
    assert bool(jnp.all(jnp.isfinite(out)))
    print("KERNEL_OK")
</pallas_src>

<mosaic_0001>
module attributes {stable_mosaic.version = 11 : i64} {
  func.func @pinohi_kernel(%arg0: memref<1x64xf32, #tpu.memory_space<vmem>>, %arg1: memref<336x64xf32, #tpu.memory_space<vmem>>, %arg2: memref<1x1xf32, #tpu.memory_space<vmem>>) attributes {dimension_semantics = [], scalar_prefetch = 0 : i64, scratch_operands = 0 : i64, tpu.core_type = #tpu.core_type<tc>} {
    %c0 = arith.constant 0 : index
    %c0_0 = arith.constant 0 : index
    %0 = vector.load %arg0[%c0, %c0_0] : memref<1x64xf32, #tpu.memory_space<vmem>>, vector<1x64xf32>
    %1 = vector.extract_strided_slice %0 {offsets = [0, 0], sizes = [1, 1], strides = [1, 1]} : vector<1x64xf32> to vector<1x1xf32>
    %c0_1 = arith.constant 0 : index
    %c0_2 = arith.constant 0 : index
    %2 = vector.load %arg1[%c0_1, %c0_2] : memref<336x64xf32, #tpu.memory_space<vmem>>, vector<64x64xf32>
    %cst = arith.constant dense<0.000000e+00> : vector<1x64xf32>
    %3 = tpu.matmul %0, %2, %cst {dimension_numbers = #tpu.dot_dimension_numbers<[1], [0], [0], [1], [0, 0, 1, 1], [], []>} : vector<1x64xf32>, vector<64x64xf32>, vector<1x64xf32> -> vector<1x64xf32>
    %c320 = arith.constant 320 : index
    %c0_3 = arith.constant 0 : index
    %4 = vector.load %arg1[%c320, %c0_3] : memref<336x64xf32, #tpu.memory_space<vmem>>, vector<1x64xf32>
    %5 = arith.addf %3, %4 : vector<1x64xf32>
    %cst_4 = arith.constant 0.000000e+00 : f32
    %6 = vector.broadcast %cst_4 : f32 to vector<1x64xf32>
    %7 = arith.cmpf ogt, %5, %6 : vector<1x64xf32>
    %cst_5 = arith.constant 0.00999999977 : f32
    %8 = vector.broadcast %cst_5 : f32 to vector<1x64xf32>
    %9 = arith.mulf %8, %5 : vector<1x64xf32>
    %10 = arith.select %7, %5, %9 : vector<1x64xi1>, vector<1x64xf32>
    %c321 = arith.constant 321 : index
    %c0_6 = arith.constant 0 : index
    %11 = vector.load %arg1[%c321, %c0_6] : memref<336x64xf32, #tpu.memory_space<vmem>>, vector<1x64xf32>
    %12 = vector.broadcast %1 : vector<1x1xf32> to vector<1x64xf32>
    %13 = arith.mulf %12, %11 : vector<1x64xf32>
    %c322 = arith.constant 322 : index
    %c0_7 = arith.constant 0 : index
    %14 = vector.load %arg1[%c322, %c0_7] : memref<336x64xf32, #tpu.memory_space<vmem>>, vector<1x64xf32>
    %15 = arith.addf %13, %14 : vector<1x64xf32>
    %cst_8 = arith.constant 0.000000e+00 : f32
    %16 = vector.broadcast %cst_8 : f32 to vector<1x64xf32>
    %17 = arith.cmpf ogt, %15, %16 : vector<1x64xf32>
    %cst_9 = arith.constant 0.00999999977 : f32
    %18 = vector.broadcast %cst_9 : f32 to vector<1x64xf32>
    %19 = arith.mulf %18, %15 : vector<1x64xf32>
    %20 = arith.select %17, %15, %19 : vector<1x64xi1>, vector<1x64xf32>
    %21 = arith.mulf %10, %20 : vector<1x64xf32>
    %c64 = arith.constant 64 : index
    %c0_10 = arith.constant 0 : index
    %22 = vector.load %arg1[%c64, %c0_10] : memref<336x64xf32, #tpu.memory_space<vmem>>, vector<64x32xf32>
    %cst_11 = arith.constant dense<0.000000e+00> : vector<1x32xf32>
    %23 = tpu.matmul %21, %22, %cst_11 {dimension_numbers = #tpu.dot_dimension_numbers<[1], [0], [0], [1], [0, 0, 1, 1], [], []>} : vector<1x64xf32>, vector<64x32xf32>, vector<1x32xf32> -> vector<1x32xf32>
    %c323 = arith.constant 323 : index
    %c0_12 = arith.constant 0 : index
    %24 = vector.load %arg1[%c323, %c0_12] : memref<336x64xf32, #tpu.memory_space<vmem>>, vector<1x32xf32>
    %25 = arith.addf %23, %24 : vector<1x32xf32>
    %c128 = arith.constant 128 : index
    %c0_13 = arith.constant 0 : index
    %26 = vector.load %arg1[%c128, %c0_13] : memref<336x64xf32, #tpu.memory_space<vmem>>, vector<64x8xf32>
    %cst_14 = arith.constant dense<0.000000e+00> : vector<1x8xf32>
    %27 = tpu.matmul %10, %26, %cst_14 {dimension_numbers = #tpu.dot_dimension_numbers<[1], [0], [0], [1], [0, 0, 1, 1], [], []>} : vector<1x64xf32>, vector<64x8xf32>, vector<1x8xf32> -> vector<1x8xf32>
    %c333 = arith.constant 333 : index
    %c0_15 = arith.constant 0 : index
    %28 = vector.load %arg1[%c333, %c0_15] : memref<336x64xf32, #tpu.memory_space<vmem>>, vector<1x8xf32>
    %29 = arith.addf %27, %28 : vector<1x8xf32>
    %cst_16 = arith.constant 2.000000e+01 : f32
    %30 = vector.broadcast %cst_16 : f32 to vector<1x8xf32>
    %31 = arith.cmpf ogt, %29, %30 : vector<1x8xf32>
    %cst_17 = arith.constant 2.000000e+01 : f32
    %32 = vector.broadcast %cst_17 : f32 to vector<1x8xf32>
    %33 = arith.minimumf %29, %32 : vector<1x8xf32>
    %34 = math.exp %33 : vector<1x8xf32>
    %cst_18 = arith.constant 1.000000e+00 : f32
    %35 = vector.broadcast %cst_18 : f32 to vector<1x8xf32>
    %36 = arith.addf %35, %34 : vector<1x8xf32>
    %37 = math.log %36 : vector<1x8xf32>
    %38 = arith.select %31, %29, %37 : vector<1x8xi1>, vector<1x8xf32>
    %39 = vector.extract_strided_slice %38 {offsets = [0, 0], sizes = [1, 1], strides = [1, 1]} : vector<1x8xf32> to vector<1x1xf32>
    %cst_19 = arith.constant 3.250000e+00 : f32
    %cst_20 = arith.constant 9.750000e+00 : f32
    %40 = vector.broadcast %cst_19 : f32 to vector<1x1xf32>
    %41 = arith.maximumf %40, %39 : vector<1x1xf32>
    %42 = vector.broadcast %cst_20 : f32 to vector<1x1xf32>
    %43 = arith.minimumf %42, %41 : vector<1x1xf32>
    %44 = vector.extract_strided_slice %38 {offsets = [0, 1], sizes = [1, 1], strides = [1, 1]} : vector<1x8xf32> to vector<1x1xf32>
    %cst_21 = arith.constant 1.700000e-01 : f32
    %cst_22 = arith.constant 5.100000e-01 : f32
    %45 = vector.broadcast %cst_21 : f32 to vector<1x1xf32>
    %46 = arith.maximumf %45, %44 : vector<1x1xf32>
    %47 = vector.broadcast %cst_22 : f32 to vector<1x1xf32>
    %48 = arith.minimumf %47, %46 : vector<1x1xf32>
    %49 = vector.extract_strided_slice %38 {offsets = [0, 2], sizes = [1, 1], strides = [1, 1]} : vector<1x8xf32> to vector<1x1xf32>
    %cst_23 = arith.constant 2.820000e+00 : f32
    %cst_24 = arith.constant 8.460000e+00 : f32
    %50 = vector.broadcast %cst_23 : f32 to vector<1x1xf32>
    %51 = arith.maximumf %50, %49 : vector<1x1xf32>
    %52 = vector.broadcast %cst_24 : f32 to vector<1x1xf32>
    %53 = arith.minimumf %52, %51 : vector<1x1xf32>
    %cst_25 = arith.constant 0.000000e+00 : f32
    %54 = vector.broadcast %cst_25 : f32 to vector<1x32xf32>
    %55 = arith.cmpf ogt, %25, %54 : vector<1x32xf32>
    %cst_26 = arith.constant 0.00999999977 : f32
    %56 = vector.broadcast %cst_26 : f32 to vector<1x32xf32>
    %57 = arith.mulf %56, %25 : vector<1x32xf32>
    %58 = arith.select %55, %25, %57 : vector<1x32xi1>, vector<1x32xf32>
    %c192 = arith.constant 192 : index
    %c0_27 = arith.constant 0 : index
    %59 = vector.load %arg1[%c192, %c0_27] : memref<336x64xf32, #tpu.memory_space<vmem>>, vector<32x32xf32>
    %cst_28 = arith.constant dense<0.000000e+00> : vector<1x32xf32>
    %60 = tpu.matmul %58, %59, %cst_28 {dimension_numbers = #tpu.dot_dimension_numbers<[1], [0], [0], [1], [0, 0, 1, 1], [], []>} : vector<1x32xf32>, vector<32x32xf32>, vector<1x32xf32> -> vector<1x32xf32>
    %c324 = arith.constant 324 : index
    %c0_29 = arith.constant 0 : index
    %61 = vector.load %arg1[%c324, %c0_29] : memref<336x64xf32, #tpu.memory_space<vmem>>, vector<1x32xf32>
    %62 = arith.addf %60, %61 : vector<1x32xf32>
    %cst_30 = arith.constant 0.000000e+00 : f32
    %63 = vector.broadcast %cst_30 : f32 to vector<1x32xf32>
    %64 = arith.cmpf ogt, %62, %63 : vector<1x32xf32>
    %cst_31 = arith.constant 0.00999999977 : f32
    %65 = vector.broadcast %cst_31 : f32 to vector<1x32xf32>
    %66 = arith.mulf %65, %62 : vector<1x32xf32>
    %67 = arith.select %64, %62, %66 : vector<1x32xi1>, vector<1x32xf32>
    %c224 = arith.constant 224 : index
    %c0_32 = arith.constant 0 : index
    %68 = vector.load %arg1[%c224, %c0_32] : memref<336x64xf32, #tpu.memory_space<vmem>>, vector<32x32xf32>
    %cst_33 = arith.constant dense<0.000000e+00> : vector<1x32xf32>
    %69 = tpu.matmul %67, %68, %cst_33 {dimension_numbers = #tpu.dot_dimension_numbers<[1], [0], [0], [1], [0, 0, 1, 1], [], []>} : vector<1x32xf32>, vector<32x32xf32>, vector<1x32xf32> -> vector<1x32xf32>
    %c325 = arith.constant 325 : index
    %c0_34 = arith.constant 0 : index
    %70 = vector.load %arg1[%c325, %c0_34] : memref<336x64xf32, #tpu.memory_space<vmem>>, vector<1x32xf32>
    %71 = arith.addf %69, %70 : vector<1x32xf32>
    %c326 = arith.constant 326 : index
    %c0_35 = arith.constant 0 : index
    %72 = vector.load %arg1[%c326, %c0_35] : memref<336x64xf32, #tpu.memory_space<vmem>>, vector<1x32xf32>
    %c327 = arith.constant 327 : index
    %c0_36 = arith.constant 0 : index
    %73 = vector.load %arg1[%c327, %c0_36] : memref<336x64xf32, #tpu.memory_space<vmem>>, vector<1x32xf32>
    %cst_37 = arith.constant dense<0.000000e+00> : vector<1xf32>
    %74 = vector.multi_reduction <add>, %71, %cst_37 [1] : vector<1x32xf32> to vector<1xf32>
    %75 = vector.shape_cast %74 : vector<1xf32> to vector<1x1xf32>
    %cst_38 = arith.constant 3.200000e+01 : f32
    %76 = vector.broadcast %cst_38 : f32 to vector<1x1xf32>
    %77 = arith.divf %75, %76 : vector<1x1xf32>
    %78 = vector.broadcast %77 : vector<1x1xf32> to vector<1x32xf32>
    %79 = arith.subf %71, %78 : vector<1x32xf32>
    %80 = vector.broadcast %77 : vector<1x1xf32> to vector<1x32xf32>
    %81 = arith.subf %71, %80 : vector<1x32xf32>
    %82 = arith.mulf %79, %81 : vector<1x32xf32>
    %cst_39 = arith.constant dense<0.000000e+00> : vector<1xf32>
    %83 = vector.multi_reduction <add>, %82, %cst_39 [1] : vector<1x32xf32> to vector<1xf32>
    %84 = vector.shape_cast %83 : vector<1xf32> to vector<1x1xf32>
    %cst_40 = arith.constant 3.200000e+01 : f32
    %85 = vector.broadcast %cst_40 : f32 to vector<1x1xf32>
    %86 = arith.divf %84, %85 : vector<1x1xf32>
    %87 = vector.broadcast %77 : vector<1x1xf32> to vector<1x32xf32>
    %88 = arith.subf %71, %87 : vector<1x32xf32>
    %cst_41 = arith.constant 9.99999974E-6 : f32
    %89 = vector.broadcast %cst_41 : f32 to vector<1x1xf32>
    %90 = arith.addf %86, %89 : vector<1x1xf32>
    %91 = math.rsqrt %90 : vector<1x1xf32>
    %92 = vector.broadcast %91 : vector<1x1xf32> to vector<1x32xf32>
    %93 = arith.mulf %88, %92 : vector<1x32xf32>
    %94 = arith.mulf %93, %72 : vector<1x32xf32>
    %95 = arith.addf %94, %73 : vector<1x32xf32>
    %96 = arith.addf %95, %58 : vector<1x32xf32>
    %cst_42 = arith.constant 0.000000e+00 : f32
    %97 = vector.broadcast %cst_42 : f32 to vector<1x32xf32>
    %98 = arith.cmpf ogt, %96, %97 : vector<1x32xf32>
    %cst_43 = arith.constant 0.00999999977 : f32
    %99 = vector.broadcast %cst_43 : f32 to vector<1x32xf32>
    %100 = arith.mulf %99, %96 : vector<1x32xf32>
    %101 = arith.select %98, %96, %100 : vector<1x32xi1>, vector<1x32xf32>
    %c256 = arith.constant 256 : index
    %c0_44 = arith.constant 0 : index
    %102 = vector.load %arg1[%c256, %c0_44] : memref<336x64xf32, #tpu.memory_space<vmem>>, vector<32x32xf32>
    %cst_45 = arith.constant dense<0.000000e+00> : vector<1x32xf32>
    %103 = tpu.matmul %101, %102, %cst_45 {dimension_numbers = #tpu.dot_dimension_numbers<[1], [0], [0], [1], [0, 0, 1, 1], [], []>} : vector<1x32xf32>, vector<32x32xf32>, vector<1x32xf32> -> vector<1x32xf32>
    %c328 = arith.constant 328 : index
    %c0_46 = arith.constant 0 : index
    %104 = vector.load %arg1[%c328, %c0_46] : memref<336x64xf32, #tpu.memory_space<vmem>>, vector<1x32xf32>
    %105 = arith.addf %103, %104 : vector<1x32xf32>
    %cst_47 = arith.constant 0.000000e+00 : f32
    %106 = vector.broadcast %cst_47 : f32 to vector<1x32xf32>
    %107 = arith.cmpf ogt, %105, %106 : vector<1x32xf32>
    %cst_48 = arith.constant 0.00999999977 : f32
    %108 = vector.broadcast %cst_48 : f32 to vector<1x32xf32>
    %109 = arith.mulf %108, %105 : vector<1x32xf32>
    %110 = arith.select %107, %105, %109 : vector<1x32xi1>, vector<1x32xf32>
    %c288 = arith.constant 288 : index
    %c0_49 = arith.constant 0 : index
    %111 = vector.load %arg1[%c288, %c0_49] : memref<336x64xf32, #tpu.memory_space<vmem>>, vector<32x32xf32>
    %cst_50 = arith.constant dense<0.000000e+00> : vector<1x32xf32>
    %112 = tpu.matmul %110, %111, %cst_50 {dimension_numbers = #tpu.dot_dimension_numbers<[1], [0], [0], [1], [0, 0, 1, 1], [], []>} : vector<1x32xf32>, vector<32x32xf32>, vector<1x32xf32> -> vector<1x32xf32>
    %c329 = arith.constant 329 : index
    %c0_51 = arith.constant 0 : index
    %113 = vector.load %arg1[%c329, %c0_51] : memref<336x64xf32, #tpu.memory_space<vmem>>, vector<1x32xf32>
    %114 = arith.addf %112, %113 : vector<1x32xf32>
    %c330 = arith.constant 330 : index
    %c0_52 = arith.constant 0 : index
    %115 = vector.load %arg1[%c330, %c0_52] : memref<336x64xf32, #tpu.memory_space<vmem>>, vector<1x32xf32>
    %c331 = arith.constant 331 : index
    %c0_53 = arith.constant 0 : index
    %116 = vector.load %arg1[%c331, %c0_53] : memref<336x64xf32, #tpu.memory_space<vmem>>, vector<1x32xf32>
    %cst_54 = arith.constant dense<0.000000e+00> : vector<1xf32>
    %117 = vector.multi_reduction <add>, %114, %cst_54 [1] : vector<1x32xf32> to vector<1xf32>
    %118 = vector.shape_cast %117 : vector<1xf32> to vector<1x1xf32>
    %cst_55 = arith.constant 3.200000e+01 : f32
    %119 = vector.broadcast %cst_55 : f32 to vector<1x1xf32>
    %120 = arith.divf %118, %119 : vector<1x1xf32>
    %121 = vector.broadcast %120 : vector<1x1xf32> to vector<1x32xf32>
    %122 = arith.subf %114, %121 : vector<1x32xf32>
    %123 = vector.broadcast %120 : vector<1x1xf32> to vector<1x32xf32>
    %124 = arith.subf %114, %123 : vector<1x32xf32>
    %125 = arith.mulf %122, %124 : vector<1x32xf32>
    %cst_56 = arith.constant dense<0.000000e+00> : vector<1xf32>
    %126 = vector.multi_reduction <add>, %125, %cst_56 [1] : vector<1x32xf32> to vector<1xf32>
    %127 = vector.shape_cast %126 : vector<1xf32> to vector<1x1xf32>
    %cst_57 = arith.constant 3.200000e+01 : f32
    %128 = vector.broadcast %cst_57 : f32 to vector<1x1xf32>
    %129 = arith.divf %127, %128 : vector<1x1xf32>
    %130 = vector.broadcast %120 : vector<1x1xf32> to vector<1x32xf32>
    %131 = arith.subf %114, %130 : vector<1x32xf32>
    %cst_58 = arith.constant 9.99999974E-6 : f32
    %132 = vector.broadcast %cst_58 : f32 to vector<1x1xf32>
    %133 = arith.addf %129, %132 : vector<1x1xf32>
    %134 = math.rsqrt %133 : vector<1x1xf32>
    %135 = vector.broadcast %134 : vector<1x1xf32> to vector<1x32xf32>
    %136 = arith.mulf %131, %135 : vector<1x32xf32>
    %137 = arith.mulf %136, %115 : vector<1x32xf32>
    %138 = arith.addf %137, %116 : vector<1x32xf32>
    %139 = arith.addf %138, %101 : vector<1x32xf32>
    %cst_59 = arith.constant 0.000000e+00 : f32
    %140 = vector.broadcast %cst_59 : f32 to vector<1x32xf32>
    %141 = arith.cmpf ogt, %139, %140 : vector<1x32xf32>
    %cst_60 = arith.constant 0.00999999977 : f32
    %142 = vector.broadcast %cst_60 : f32 to vector<1x32xf32>
    %143 = arith.mulf %142, %139 : vector<1x32xf32>
    %144 = arith.select %141, %139, %143 : vector<1x32xi1>, vector<1x32xf32>
    %c334 = arith.constant 334 : index
    %c0_61 = arith.constant 0 : index
    %145 = vector.load %arg1[%c334, %c0_61] : memref<336x64xf32, #tpu.memory_space<vmem>>, vector<1x8xf32>
    %c332 = arith.constant 332 : index
    %c0_62 = arith.constant 0 : index
    %146 = vector.load %arg1[%c332, %c0_62] : memref<336x64xf32, #tpu.memory_space<vmem>>, vector<1x32xf32>
    %147 = arith.mulf %144, %146 : vector<1x32xf32>
    %cst_63 = arith.constant dense<0.000000e+00> : vector<1xf32>
    %148 = vector.multi_reduction <add>, %147, %cst_63 [1] : vector<1x32xf32> to vector<1xf32>
    %149 = vector.shape_cast %148 : vector<1xf32> to vector<1x1xf32>
    %150 = vector.extract_strided_slice %145 {offsets = [0, 0], sizes = [1, 1], strides = [1, 1]} : vector<1x8xf32> to vector<1x1xf32>
    %151 = arith.addf %149, %150 : vector<1x1xf32>
    %152 = vector.extract_strided_slice %0 {offsets = [0, 14], sizes = [1, 1], strides = [1, 1]} : vector<1x64xf32> to vector<1x1xf32>
    %153 = vector.extract_strided_slice %0 {offsets = [0, 15], sizes = [1, 1], strides = [1, 1]} : vector<1x64xf32> to vector<1x1xf32>
    %154 = vector.extract_strided_slice %0 {offsets = [0, 16], sizes = [1, 1], strides = [1, 1]} : vector<1x64xf32> to vector<1x1xf32>
    %155 = vector.extract_strided_slice %0 {offsets = [0, 17], sizes = [1, 1], strides = [1, 1]} : vector<1x64xf32> to vector<1x1xf32>
    %156 = vector.extract_strided_slice %0 {offsets = [0, 18], sizes = [1, 1], strides = [1, 1]} : vector<1x64xf32> to vector<1x1xf32>
    %cst_64 = arith.constant 0.000000e+00 : f32
    %157 = vector.broadcast %cst_64 : f32 to vector<1x1xf32>
    %158 = arith.cmpf ole, %1, %157 : vector<1x1xf32>
    %cst_65 = arith.constant 1.000000e-03 : f32
    %159 = vector.broadcast %cst_65 : f32 to vector<1x1xf32>
    %160 = arith.select %158, %159, %1 : vector<1x1xi1>, vector<1x1xf32>
    %cst_66 = arith.constant 1.000000e+04 : f32
    %161 = vector.broadcast %cst_66 : f32 to vector<1x1xf32>
    %162 = arith.mulf %161, %43 : vector<1x1xf32>
    %cst_67 = arith.constant 1.000000e+02 : f32
    %163 = vector.broadcast %cst_67 : f32 to vector<1x1xf32>
    %164 = arith.mulf %163, %53 : vector<1x1xf32>
    %165 = arith.mulf %48, %48 : vector<1x1xf32>
    %cst_68 = arith.constant 1.000000e+00 : f32
    %166 = vector.broadcast %cst_68 : f32 to vector<1x1xf32>
    %167 = arith.subf %166, %165 : vector<1x1xf32>
    %168 = arith.mulf %155, %155 : vector<1x1xf32>
    %169 = arith.mulf %168, %155 : vector<1x1xf32>
    %170 = arith.mulf %162, %169 : vector<1x1xf32>
    %171 = arith.mulf %170, %153 : vector<1x1xf32>
    %cst_69 = arith.constant 1.200000e+01 : f32
    %172 = vector.broadcast %cst_69 : f32 to vector<1x1xf32>
    %173 = arith.mulf %172, %167 : vector<1x1xf32>
    %174 = arith.divf %171, %173 : vector<1x1xf32>
    %175 = arith.divf %160, %174 : vector<1x1xf32>
    %176 = math.sqrt %175 : vector<1x1xf32>
    %cst_70 = arith.constant 0.353553385 : f32
    %177 = vector.broadcast %cst_70 : f32 to vector<1x1xf32>
    %178 = arith.mulf %176, %177 : vector<1x1xf32>
    %179 = arith.mulf %176, %156 : vector<1x1xf32>
    %180 = math.exp %179 : vector<1x1xf32>
    %181 = arith.mulf %178, %154 : vector<1x1xf32>
    %182 = math.exp %181 : vector<1x1xf32>
    %cst_71 = arith.constant 1.000000e+00 : f32
    %183 = vector.broadcast %cst_71 : f32 to vector<1x1xf32>
    %184 = arith.divf %183, %180 : vector<1x1xf32>
    %cst_72 = arith.constant 1.000000e+00 : f32
    %185 = vector.broadcast %cst_72 : f32 to vector<1x1xf32>
    %186 = arith.divf %185, %182 : vector<1x1xf32>
    %187 = arith.addf %180, %184 : vector<1x1xf32>
    %cst_73 = arith.constant 5.000000e-01 : f32
    %188 = vector.broadcast %cst_73 : f32 to vector<1x1xf32>
    %189 = arith.mulf %188, %187 : vector<1x1xf32>
    %190 = arith.subf %180, %184 : vector<1x1xf32>
    %cst_74 = arith.constant 5.000000e-01 : f32
    %191 = vector.broadcast %cst_74 : f32 to vector<1x1xf32>
    %192 = arith.mulf %191, %190 : vector<1x1xf32>
    %193 = arith.addf %182, %186 : vector<1x1xf32>
    %cst_75 = arith.constant 5.000000e-01 : f32
    %194 = vector.broadcast %cst_75 : f32 to vector<1x1xf32>
    %195 = arith.mulf %194, %193 : vector<1x1xf32>
    %196 = arith.subf %182, %186 : vector<1x1xf32>
    %cst_76 = arith.constant 5.000000e-01 : f32
    %197 = vector.broadcast %cst_76 : f32 to vector<1x1xf32>
    %198 = arith.mulf %197, %196 : vector<1x1xf32>
    %199 = arith.mulf %178, %189 : vector<1x1xf32>
    %200 = arith.mulf %199, %195 : vector<1x1xf32>
    %201 = arith.mulf %176, %192 : vector<1x1xf32>
    %202 = arith.mulf %201, %198 : vector<1x1xf32>
    %203 = arith.addf %200, %202 : vector<1x1xf32>
    %204 = arith.mulf %176, %189 : vector<1x1xf32>
    %205 = arith.mulf %204, %198 : vector<1x1xf32>
    %206 = arith.mulf %178, %192 : vector<1x1xf32>
    %207 = arith.mulf %206, %195 : vector<1x1xf32>
    %208 = arith.addf %205, %207 : vector<1x1xf32>
    %209 = arith.addf %156, %154 : vector<1x1xf32>
    %210 = arith.mulf %176, %209 : vector<1x1xf32>
    %211 = arith.mulf %210, %203 : vector<1x1xf32>
    %212 = arith.subf %208, %211 : vector<1x1xf32>
    %213 = arith.addf %155, %152 : vector<1x1xf32>
    %214 = arith.mulf %178, %195 : vector<1x1xf32>
    %215 = arith.subf %203, %214 : vector<1x1xf32>
    %216 = arith.mulf %213, %215 : vector<1x1xf32>
    %cst_77 = arith.constant 2.000000e+00 : f32
    %217 = vector.broadcast %cst_77 : f32 to vector<1x1xf32>
    %218 = arith.mulf %217, %212 : vector<1x1xf32>
    %219 = arith.divf %216, %218 : vector<1x1xf32>
    %220 = arith.addf %155, %152 : vector<1x1xf32>
    %cst_78 = arith.constant 0.000000e+00 : f32
    %221 = vector.broadcast %cst_78 : f32 to vector<1x1xf32>
    %222 = arith.subf %221, %220 : vector<1x1xf32>
    %cst_79 = arith.constant 5.000000e-01 : f32
    %223 = vector.broadcast %cst_79 : f32 to vector<1x1xf32>
    %224 = arith.mulf %222, %223 : vector<1x1xf32>
    %225 = arith.addf %156, %154 : vector<1x1xf32>
    %226 = arith.mulf %176, %225 : vector<1x1xf32>
    %227 = arith.mulf %226, %219 : vector<1x1xf32>
    %228 = arith.subf %224, %227 : vector<1x1xf32>
    %229 = arith.mulf %228, %228 : vector<1x1xf32>
    %230 = arith.mulf %219, %219 : vector<1x1xf32>
    %cst_80 = arith.constant 2.000000e+00 : f32
    %231 = vector.broadcast %cst_80 : f32 to vector<1x1xf32>
    %232 = arith.mulf %231, %192 : vector<1x1xf32>
    %233 = arith.mulf %232, %189 : vector<1x1xf32>
    %cst_81 = arith.constant 2.000000e+00 : f32
    %234 = vector.broadcast %cst_81 : f32 to vector<1x1xf32>
    %235 = arith.mulf %234, %192 : vector<1x1xf32>
    %236 = arith.mulf %235, %192 : vector<1x1xf32>
    %237 = arith.mulf %176, %176 : vector<1x1xf32>
    %238 = arith.mulf %237, %176 : vector<1x1xf32>
    %cst_82 = arith.constant 2.500000e-01 : f32
    %239 = vector.broadcast %cst_82 : f32 to vector<1x1xf32>
    %240 = arith.mulf %239, %238 : vector<1x1xf32>
    %cst_83 = arith.constant 2.000000e+00 : f32
    %241 = vector.broadcast %cst_83 : f32 to vector<1x1xf32>
    %242 = arith.mulf %241, %176 : vector<1x1xf32>
    %243 = arith.mulf %242, %156 : vector<1x1xf32>
    %244 = arith.subf %229, %230 : vector<1x1xf32>
    %245 = arith.mulf %243, %244 : vector<1x1xf32>
    %246 = arith.addf %229, %230 : vector<1x1xf32>
    %247 = arith.mulf %246, %233 : vector<1x1xf32>
    %248 = arith.addf %245, %247 : vector<1x1xf32>
    %cst_84 = arith.constant 2.000000e+00 : f32
    %249 = vector.broadcast %cst_84 : f32 to vector<1x1xf32>
    %250 = arith.mulf %249, %228 : vector<1x1xf32>
    %251 = arith.mulf %250, %219 : vector<1x1xf32>
    %252 = arith.mulf %251, %236 : vector<1x1xf32>
    %253 = arith.addf %248, %252 : vector<1x1xf32>
    %254 = arith.mulf %240, %253 : vector<1x1xf32>
    %255 = tpu.reciprocal %162 {approx = true} : vector<1x1xf32> -> vector<1x1xf32>
    %256 = arith.mulf %153, %155 : vector<1x1xf32>
    %257 = tpu.reciprocal %256 {approx = true} : vector<1x1xf32> -> vector<1x1xf32>
    %258 = arith.mulf %160, %257 : vector<1x1xf32>
    %cst_85 = arith.constant 5.000000e-01 : f32
    %259 = vector.broadcast %cst_85 : f32 to vector<1x1xf32>
    %260 = arith.mulf %259, %255 : vector<1x1xf32>
    %261 = arith.mulf %260, %153 : vector<1x1xf32>
    %262 = arith.mulf %162, %162 : vector<1x1xf32>
    %263 = arith.mulf %262, %169 : vector<1x1xf32>
    %264 = arith.mulf %263, %254 : vector<1x1xf32>
    %cst_86 = arith.constant 1.200000e+01 : f32
    %265 = vector.broadcast %cst_86 : f32 to vector<1x1xf32>
    %266 = arith.mulf %265, %167 : vector<1x1xf32>
    %267 = arith.mulf %266, %167 : vector<1x1xf32>
    %268 = arith.divf %264, %267 : vector<1x1xf32>
    %269 = arith.mulf %156, %155 : vector<1x1xf32>
    %270 = arith.mulf %269, %258 : vector<1x1xf32>
    %271 = arith.mulf %270, %258 : vector<1x1xf32>
    %272 = arith.addf %268, %271 : vector<1x1xf32>
    %273 = arith.mulf %261, %272 : vector<1x1xf32>
    %274 = arith.mulf %160, %160 : vector<1x1xf32>
    %275 = arith.mulf %274, %154 : vector<1x1xf32>
    %276 = arith.mulf %255, %257 : vector<1x1xf32>
    %cst_87 = arith.constant 0.333333343 : f32
    %277 = vector.broadcast %cst_87 : f32 to vector<1x1xf32>
    %278 = arith.mulf %276, %277 : vector<1x1xf32>
    %279 = arith.mulf %275, %278 : vector<1x1xf32>
    %280 = arith.mulf %160, %160 : vector<1x1xf32>
    %281 = arith.mulf %280, %152 : vector<1x1xf32>
    %cst_88 = arith.constant 2.500000e-01 : f32
    %282 = vector.broadcast %cst_88 : f32 to vector<1x1xf32>
    %283 = arith.mulf %281, %282 : vector<1x1xf32>
    %284 = arith.mulf %164, %153 : vector<1x1xf32>
    %285 = arith.mulf %284, %154 : vector<1x1xf32>
    %286 = tpu.reciprocal %285 {approx = true} : vector<1x1xf32> -> vector<1x1xf32>
    %287 = arith.mulf %283, %286 : vector<1x1xf32>
    %288 = arith.mulf %160, %160 : vector<1x1xf32>
    %cst_89 = arith.constant 2.000000e+00 : f32
    %289 = vector.broadcast %cst_89 : f32 to vector<1x1xf32>
    %290 = arith.mulf %289, %287 : vector<1x1xf32>
    %291 = arith.addf %273, %279 : vector<1x1xf32>
    %cst_90 = arith.constant 4.000000e+00 : f32
    %292 = vector.broadcast %cst_90 : f32 to vector<1x1xf32>
    %293 = arith.mulf %292, %291 : vector<1x1xf32>
    %294 = arith.addf %290, %293 : vector<1x1xf32>
    %295 = tpu.reciprocal %294 {approx = true} : vector<1x1xf32> -> vector<1x1xf32>
    %296 = arith.mulf %288, %295 : vector<1x1xf32>
    %cst_91 = arith.constant 8.33333353E-4 : f32
    %297 = vector.broadcast %cst_91 : f32 to vector<1x1xf32>
    %298 = arith.mulf %296, %297 : vector<1x1xf32>
    %299 = vector.extract_strided_slice %145 {offsets = [0, 1], sizes = [1, 1], strides = [1, 1]} : vector<1x8xf32> to vector<1x1xf32>
    %300 = arith.mulf %298, %299 : vector<1x1xf32>
    %301 = vector.extract_strided_slice %145 {offsets = [0, 2], sizes = [1, 1], strides = [1, 1]} : vector<1x8xf32> to vector<1x1xf32>
    %302 = arith.addf %300, %301 : vector<1x1xf32>
    %303 = arith.addf %151, %302 : vector<1x1xf32>
    %c0_92 = arith.constant 0 : index
    %c0_93 = arith.constant 0 : index
    %304 = vector.load %arg2[%c0_92, %c0_93] : memref<1x1xf32, #tpu.memory_space<vmem>>, vector<1x1xf32>
    tpu.vector_store %arg2[%c0_92, %c0_93], %303 {strides = array<i32>} : memref<1x1xf32, #tpu.memory_space<vmem>>, vector<1x1xf32>,
    return
  }
}

</mosaic_0001>

<bundles_post_ra>
// kernel: tpu_custom_call.1
= control target key start
LH: loop header
LB: loop body
LE: loop exit
PB: predicated region body
PF: predicated region fallthrough
CT: control target
= control target key end

     0   :  { %v1251_v3 = vmov 0.0|0.0   ;;  %vm1252_vm0 = vmmov 0   ;;  %v1253_v6 = vmov 0.0   ;;  %v1254_v8 = vmov 0   ;;  %s1652_s0 = inlined_call_operand.vmem [shape: f32[1,64], index: 0, kind: input, shape index: {}]   ;;  %s1653_s1 = inlined_call_operand.vmem [shape: f32[336,64], index: 1, kind: input, shape index: {}]   ;;  %s1654_s2 = inlined_call_operand.hbm [shape: f32[1,1], index: 2, kind: output, shape index: {}]  }
   0x1   :  { %v13_v0 = vld [vmem:[%s1653_s1] sm:$0xff]  ;;  %v14_v1 = vld [vmem:[%s1653_s1 + $0x8] sm:$0xff]  ;;  %v15_v2 = vld [vmem:[%s1653_s1 + $0x10] sm:$0xff]  ;;  %1113 = vmatprep.subr.bf16.mxu0 %v1251_v3  ;;  %1028 = vmatprep.mubr.msk.f32.mxu0 %vm1252_vm0, %v1253_v6 }
   0x2   :  { %v1114_v4 = vpack.c.bf16 %v14_v1, %v13_v0  ;;  %v16_v5 = vld [vmem:[%s1653_s1 + $0x18] sm:$0xff]  ;;  %v1303_v7 = vld [vmem:[%s1652_s0] sm:$0x1]  ;;  %1192 = vset.pattern.permute.xlu0 %v1254_v8  ;;  %1125 = vmatprep.subr.bf16.mxu1 %v1251_v3  ;;  %v18_v12 = vld [vmem:[%s1653_s1 + $0x28] sm:$0xff] }
   0x3   :  { %v1117_v9 = vpack.c.bf16 %v16_v5, %v15_v2  ;;  %101 = vperm.xlu0 %1192, %v1303_v7   ;;  %v115_v10 = vld [vmem:[%s1653_s1 + $0x40] sm:$0xff]  ;;  %v116_v13 = vld [vmem:[%s1653_s1 + $0x48] sm:$0xff]  ;;  %1047 = vmatprep.mubr.msk.f32.mxu1 %vm1252_vm0, %v1253_v6 }
   0x4   :  { %1115 = vmatpush3.bf16.msra.mxu0 %v1114_v4  ;;  %v17_v11 = vld [vmem:[%s1653_s1 + $0x20] sm:$0xff]  ;;  %v1126_v14 = vpack.c.bf16 %v116_v13, %v115_v10 }
   0x5   :  { %1116 = vmatprep.subr.bf16.mxu0 %v1251_v3 }
   0x6   :  { %7 = vsyncpa [#allocation3], 0  ;;  %v1120_v15 = vpack.c.bf16 %v18_v12, %v17_v11  ;;  %1127 = vmatpush3.bf16.msra.mxu1 %v1126_v14  ;;  %v19_v16 = vld [vmem:[%s1653_s1 + $0x30] sm:$0xff]  ;;  %v20_v17 = vld [vmem:[%s1653_s1 + $0x38] sm:$0xff]  ;;  %vm22_vm1 = vcmask 523264   ;;  %v104_v40 = vlaneseq  ;;  %vm301_vm5 = vcmask 261120  }
   0x7   :  { %1128 = vmatprep.subr.bf16.mxu1 %v1251_v3  ;;  %v117_v18 = vld [vmem:[%s1653_s1 + $0x50] sm:$0xff]  ;;  %v118_v19 = vld [vmem:[%s1653_s1 + $0x58] sm:$0xff]  ;;  %v1123_v20 = vpack.c.bf16 %v20_v17, %v19_v16  ;;  %v197_v22 = vld [vmem:[%s1653_s1 + $0x80] sm:$0xff]  ;;  %vm458_vm7 = vcmask 253952   ;;  %s1255_s28 = smov 112   ;;  %s1256_s3 = smov 127  }
   0x8   :  { %1118 = vmatpush3.bf16.msra.mxu0 %v1117_v9  ;;  %v1129_v21 = vpack.c.bf16 %v118_v19, %v117_v18  ;;  %v198_v23 = vld [vmem:[%s1653_s1 + $0x88] sm:$0xff]  ;;  %v199_v25 = vld [vmem:[%s1653_s1 + $0x90] sm:$0xff]  ;;  %v200_v26 = vld [vmem:[%s1653_s1 + $0x98] sm:$0xff]  ;;  %v1385_v41 = vshrl.u32 %v104_v40, 7  ;;  %s1257_s4 = smov 111   ;;  %s1258_s5 = smov 113  }
   0x9   :  { %1119 = vmatprep.subr.bf16.mxu0 %v1251_v3  ;;  %v1138_v24 = vpack.c.bf16 %v198_v23, %v197_v22  ;;  %v1141_v27 = vpack.c.bf16 %v200_v26, %v199_v25  ;;  %v201_v28 = vld [vmem:[%s1653_s1 + $0xa0] sm:$0xff]  ;;  %v202_v29 = vld [vmem:[%s1653_s1 + $0xa8] sm:$0xff]  ;;  %v203_v34 = vld [vmem:[%s1653_s1 + $0xb0] sm:$0xff]  ;;  %s1259_s6 = smov 2   ;;  %s1260_s15 = smov 110   ;;  %vm666_vm10 = vcmp.le.f32.partialorder %v1303_v7, 0.0 }
   0xa   :  { %1130 = vmatpush3.bf16.msra.mxu1 %v1129_v21  ;;  %v1144_v30 = vpack.c.bf16 %v202_v29, %v201_v28  ;;  %v119_v31 = vld [vmem:[%s1653_s1 + $0x60] sm:$0xff]  ;;  %v120_v32 = vld [vmem:[%s1653_s1 + $0x68] sm:$0xff]  ;;  %v204_v35 = vld [vmem:[%s1653_s1 + $0xb8] sm:$0xff]  ;;  %v1388_v42 = vsub.s32 0, %v1385_v41  ;;  %s1261_s27 = smov 17   ;;  %s1263_s29 = smov 126  }
   0xb   :  { %1131 = vmatprep.subr.bf16.mxu1 %v1251_v3  ;;  %v1132_v33 = vpack.c.bf16 %v120_v32, %v119_v31  ;;  %v1147_v36 = vpack.c.bf16 %v204_v35, %v203_v34  ;;  %v121_v37 = vld [vmem:[%s1653_s1 + $0x70] sm:$0xff]  ;;  %v122_v38 = vld [vmem:[%s1653_s1 + $0x78] sm:$0xff]  ;;  %v99_v45 = vld [vmem:[%s1653_s1 + $0x141] sm:$0x1]  ;;  %s1264_s7 = smov 115   ;;  %s1265_s10 = smov 114  }
   0xc   :  { %1121 = vmatpush3.bf16.msra.mxu0 %v1120_v15  ;;  %v1135_v39 = vpack.c.bf16 %v122_v38, %v121_v37  ;;  %v109_v47 = vld [vmem:[%s1653_s1 + $0x142] sm:$0x1]  ;;  %v21_v49 = vld [vmem:[%s1653_s1 + $0x140] sm:$0x1]  ;;  %v297_v59 = vld [vmem:[%s1653_s1 + $0xc8] sm:$0xff]  ;;  %s1266_s11 = smov 18  }
   0xd   :  { %1122 = vmatprep.subr.bf16.mxu0 %v1251_v3  ;;  %v296_v58 = vld [vmem:[%s1653_s1 + $0xc0] sm:$0xff]  ;;  %v298_v61 = vld [vmem:[%s1653_s1 + $0xd0] sm:$0xff]  ;;  %v299_v62 = vld [vmem:[%s1653_s1 + $0xd8] sm:$0xff]  ;;  %s1267_s12 = smov 1   ;;  %vm942_vm15 = vcmask 0  }
   0xe   :  { %1133 = vmatpush3.bf16.msra.mxu1 %v1132_v33  ;;  %v1150_v60 = vpack.c.bf16 %v297_v59, %v296_v58  ;;  %v1153_v63 = vpack.c.bf16 %v299_v62, %v298_v61  ;;  %v123_v1 = vld [vmem:[%s1653_s1 + $0x143] sm:$0x1]  ;;  %v379_v8 = vld [vmem:[%s1653_s1 + $0xe8] sm:$0xff]  ;;  %v380_v14 = vld [vmem:[%s1653_s1 + $0xf0] sm:$0xff] }
   0xf   :  { %1134 = vmatprep.subr.bf16.mxu1 %v1251_v3  ;;  %v378_v5 = vld [vmem:[%s1653_s1 + $0xe0] sm:$0xff]  ;;  %v381_v15 = vld [vmem:[%s1653_s1 + $0xf8] sm:$0xff]  ;;  %v205_v28 = vld [vmem:[%s1653_s1 + $0x14d] sm:$0x1] }
  0x10   :  { %1124 = vmatpush3.bf16.msra.mxu0 %v1123_v20  ;;  %v1156_v12 = vpack.c.bf16 %v379_v8, %v378_v5  ;;  %v1159_v16 = vpack.c.bf16 %v381_v15, %v380_v14  ;;  %v300_v17 = vld [vmem:[%s1653_s1 + $0x144] sm:$0x1]  ;;  %v382_v23 = vld [vmem:[%s1653_s1 + $0x145] sm:$0x1] }
  0x11   :  { %1137 = vmatprep.subr.bf16.mxu0 %v1251_v3 }
  0x12   :  { %1136 = vmatpush3.bf16.msra.mxu1 %v1135_v39 }
  0x13   :  { %1029 = vmatmul.mubr.msk.f32.vlgmr.msra.gmra.mrb[0].mxu0 %vm22_vm1, %v1303_v7  ;;  %1149 = vmatprep.subr.bf16.mxu1 %v1251_v3 }
  0x14   :  { %1139 = vmatpush3.bf16.msra.mxu0 %v1138_v24  ;;  %1066 = vmatprep.mubr.msk.f32.mxu0 %vm1252_vm0, %v1253_v6 }
  0x15   :  { %1140 = vmatprep.subr.bf16.mxu0 %v1251_v3 }
  0x18   :  { %1142 = vmatpush3.bf16.msra.mxu0 %v1141_v27 }
  0x19   :  { %1143 = vmatprep.subr.bf16.mxu0 %v1251_v3 }
  0x1c   :  { %1145 = vmatpush3.bf16.msra.mxu0 %v1144_v30 }
  0x1d   :  { %1146 = vmatprep.subr.bf16.mxu0 %v1251_v3 }
  0x20   :  { %1148 = vmatpush3.bf16.msra.mxu0 %v1147_v36 }
  0x21   :  { %1161 = vmatprep.subr.bf16.mxu0 %v1251_v3 }
  0x82   :  { %v102_v43 = vpop.permute.xlu0 %101 }
  0x83   :  { %v107_v44 = vrot.slane %v102_v43, %v1388_v42 }
  0x85   :  { %v108_v46 = vmul.f32 %v107_v44, %v99_v45 }
  0x87   :  { %v110_v48 = vadd.f32 %v109_v47, %v108_v46  ;;  %v672_v46 = vmul.f32 %v1303_v7, %v1303_v7 }
  0x89   :  { %v112_v51 = vmul.f32 0.01, %v110_v48  ;;  %vm111_vm2 = vcmp.gt.f32.partialorder %v110_v48, 0.0 }
  0x8b   :  { %v113_v56 = vsel %vm111_vm2, %v110_v48, %v112_v51  ;;  %v673_v48 = vmul.f32 %v672_v46, %v1303_v7  ;;  %v1477_v51 = vrot.slane %v1303_v7, %v1388_v42 }
  0xe6   :  { %v92_v50 = vpop.f32.mrb[0].mxu0 }
  0xe7   :  { %v93_v52 = vadd.f32 %v92_v50, %v21_v49  ;;  %v1030_v53 = vpop.f32.mrb[1].mxu0  ;;  %v678_v50 = vrot.slane %v673_v48, %v1388_v42 }
  0xe8   :  { %v480_v53 = vld [vmem:[%s1653_s1 + $0x108] sm:$0xff] }
  0xe9   :  { %vm96_vm3 = vcmp.gt.f32.partialorder %v93_v52, 0.0  ;;  %v97_v54 = vmul.f32 0.01, %v93_v52 }
  0xeb   :  { %v98_v55 = vsel %vm96_vm3, %v93_v52, %v97_v54  ;;  %v479_v52 = vld [vmem:[%s1653_s1 + $0x100] sm:$0xff] }
  0xec   :  { %v114_v57 = vmul.f32 %v113_v56, %v98_v55  ;;  %1067 = vmatmul.mubr.msk.f32.vlgmr.msra.gmra.mrb[2].mxu0 %vm22_vm1, %v98_v55  ;;  %v1162_v54 = vpack.c.bf16 %v480_v53, %v479_v52  ;;  %v481_v55 = vld [vmem:[%s1653_s1 + $0x110] sm:$0xff]  ;;  %v482_v56 = vld [vmem:[%s1653_s1 + $0x118] sm:$0xff] }
  0xed   :  { %1099 = vmatprep.mubr.msk.f32.mxu0 %vm1252_vm0, %v1253_v6  ;;  %v562_v53 = vld [vmem:[%s1653_s1 + $0x130] sm:$0xff] }
  0xee   :  { %1048 = vmatmul.mubr.msk.f32.vlgmr.msra.gmra.mrb[0].mxu1 %vm22_vm1, %v114_v57  ;;  %1163 = vmatpush3.bf16.msra.mxu0 %v1162_v54  ;;  %v1165_v57 = vpack.c.bf16 %v482_v56, %v481_v55  ;;  %v563_v54 = vld [vmem:[%s1653_s1 + $0x138] sm:$0xff] }
  0xef   :  { %1077 = vmatprep.mubr.msk.f32.mxu1 %vm1252_vm0, %v1253_v6  ;;  %1151 = vmatpush3.bf16.msra.mxu1 %v1150_v60  ;;  %v1171_v55 = vpack.c.bf16 %v563_v54, %v562_v53 }
  0xf0   :  { %1152 = vmatprep.subr.bf16.mxu1 %v1251_v3  ;;  %1164 = vmatprep.subr.bf16.mxu0 %v1251_v3 }
  0xf2   :  { %1166 = vmatpush3.bf16.msra.mxu0 %v1165_v57 }
  0xf3   :  { %1154 = vmatpush3.bf16.msra.mxu1 %v1153_v63 }
  0xf4   :  { %1155 = vmatprep.subr.bf16.mxu1 %v1251_v3 }
 0x1bf   :  { %v275_v0 = vpop.f32.mrb[2].mxu0 }
 0x1c0   :  { %v1068_v2 = vpop.f32.mrb[3].mxu0  ;;  %v276_v29 = vadd.f32 %v275_v0, %v205_v28 }
 0x1c1   :  { %v193_v4 = vpop.f32.mrb[0].mxu1 }
 0x1c2   :  { %v194_v9 = vadd.f32 %v193_v4, %v123_v1  ;;  %v1049_v10 = vpop.f32.mrb[1].mxu1  ;;  %vm279_vm8 = vcmp.gt.f32.partialorder %v276_v29, 20.0 }
 0x1c4   :  { %vm293_vm4 = vcmp.gt.f32.partialorder %v194_v9, 0.0  ;;  %v294_v11 = vmul.f32 0.01, %v194_v9 }
 0x1c6   :  { %v1429_v13 = vsel %vm293_vm4, %v194_v9, %v294_v11  ;;  %v456_v9 = vld [vmem:[%s1653_s1 + $0x146] sm:$0x1] }
 0x1c7   :  { %1078 = vmatmul.mubr.msk.f32.vlgmr.msra.gmra.mrb[2].mxu1 %vm301_vm5, %v1429_v13 }
 0x1c8   :  { %1157 = vmatpush3.bf16.msra.mxu1 %v1156_v12  ;;  %1088 = vmatprep.mubr.msk.f32.mxu1 %vm1252_vm0, %v1253_v6 }
 0x1c9   :  { %1158 = vmatprep.subr.bf16.mxu1 %v1251_v3 }
 0x1cc   :  { %1160 = vmatpush3.bf16.msra.mxu1 %v1159_v16  ;;  %v457_v16 = vld [vmem:[%s1653_s1 + $0x147] sm:$0x1] }
 0x1cd   :  { %1167 = vmatprep.subr.bf16.mxu1 %v1251_v3 }
 0x29a   :  { %v371_v18 = vpop.f32.mrb[2].mxu1 }
 0x29b   :  { %v372_v19 = vadd.f32 %v371_v18, %v300_v17  ;;  %v1079_v20 = vpop.f32.mrb[3].mxu1 }
 0x29d   :  { %vm375_vm6 = vcmp.gt.f32.partialorder %v372_v19, 0.0  ;;  %v376_v21 = vmul.f32 0.01, %v372_v19 }
 0x29f   :  { %v377_v22 = vsel %vm375_vm6, %v372_v19, %v376_v21 }
 0x2a0   :  { %1089 = vmatmul.mubr.msk.f32.vlgmr.msra.gmra.mrb[4].mxu1 %vm301_vm5, %v377_v22  ;;  %v560_v22 = vld [vmem:[%s1653_s1 + $0x120] sm:$0xff] }
 0x2a1   :  { %1110 = vmatprep.mubr.msk.f32.mxu1 %vm1252_vm0, %v1253_v6  ;;  %v280_v6 = vmin.f32 %v276_v29, 20.0 }
 0x2a3   :  { %v281_v30 = vmul.f32 1.442695, %v280_v6 }
 0x2a5   :  { %1193 = vpow2.f32 %v281_v30 }
 0x2af   :  { %v1194_v31 = vpop.eup %1193 }
 0x2b0   :  { %v283_v32 = vadd.f32 1.0, %v1194_v31 }
 0x2b2   :  { %1195 = vlog2.f32 %v283_v32 }
 0x2bc   :  { %v1196_v33 = vpop.eup %1195 }
 0x2bd   :  { %v285_v34 = vmul.f32 0.6931472, %v1196_v33 }
 0x2bf   :  { %v1457_v38 = vsel %vm279_vm8, %v276_v29, %v285_v34 }
 0x2c0   :  { %v289_v40 = vmax.f32 %v1457_v38, 0.17  ;;  %v287_v60 = vmax.f32 %v1457_v38, 3.25 }
 0x2c2   :  { %v290_v44 = vmin.f32 %v289_v40, 0.51  ;;  %v288_v63 = vmin.f32 %v287_v60, 9.75 }
 0x2c4   :  { %v1461_v45 = vmul.f32 %v290_v44, %v290_v44  ;;  %v1500_v1 = vmul.f32 10000.0, %v288_v63 }
 0x2c6   :  { %v671_v47 = vsub.f32 1.0, %v1461_v45 }
 0x2c8   :  { %v1469_v49 = vmul.f32 12.0, %v671_v47 }
 0x373   :  { %v452_v24 = vpop.f32.mrb[4].mxu1 }
 0x374   :  { %v453_v25 = vadd.f32 %v452_v24, %v382_v23  ;;  %v1090_v26 = vpop.f32.mrb[5].mxu1  ;;  %v561_v23 = vld [vmem:[%s1653_s1 + $0x128] sm:$0xff]  ;;  %v1528_v24 = vsel %vm666_vm10, 0.001, %v1303_v7 }
 0x376   :  { %v459_v27 = vsel %vm458_vm7, %v453_v25, 0.0 }
 0x377   :  { %460 = vadd.xlane.f32.xlu0 %v459_v27 }
 0x38d   :  { %714 = vrot.lane.b32.xlu0 %v1303_v7, %s1255_s28  ;;  %s1262_s28 = smov 3  }
 0x404   :  { %v461_v35 = vpop.xlane.xlu0 %460 }
 0x405   :  { %v463_v36 = vmul.f32 0.03125, %v461_v35 }
 0x407   :  { %v464_v37 = vsub.f32 %v453_v25, %v463_v36 }
 0x408   :  { %v1547_v46 = vpop.permute.xlu0 %714 }
 0x409   :  { %v465_v39 = vmul.f32 %v464_v37, %v464_v37 }
 0x40b   :  { %v466_v43 = vsel %vm458_vm7, %v465_v39, 0.0 }
 0x40c   :  { %467 = vadd.xlane.f32.xlu1 %v466_v43 }
 0x41d   :  { %693 = vrot.lane.b32.xlu1 %v1469_v49, %s1256_s3 }
 0x421   :  { %679 = vrot.lane.b32.xlu1 %v678_v50, %s1257_s4 }
 0x425   :  { %687 = vrot.lane.b32.xlu1 %v1477_v51, %s1258_s5 }
 0x429   :  { %742 = vrot.lane.b32.xlu1 %v1303_v7, %s1259_s6 }
 0x42d   :  { %708 = vrot.lane.b32.xlu1 %v1303_v7, %s1260_s15 }
 0x499   :  { %v468_v58 = vpop.xlane.xlu1 %467 }
 0x49a   :  { %v469_v59 = vmul.f32 0.03125, %v468_v58 }
 0x49c   :  { %v470_v61 = vadd.f32 1e-05, %v469_v59 }
 0x49d   :  { %v694_v62 = vpop.permute.xlu1 %693 }
 0x49e   :  { %1197 = vrsqrt.f32 %v470_v61 }
 0x49f   :  { %1199 = vrcp.f32 %v694_v62 }
 0x4a1   :  { %v1498_v0 = vpop.permute.xlu1 %679 }
 0x4a2   :  { %v682_v2 = vmul.f32 %v1498_v0, %v1500_v1 }
 0x4a5   :  { %v1504_v4 = vpop.permute.xlu1 %687 }
 0x4a6   :  { %v690_v5 = vmul.f32 %v1504_v4, %v682_v2 }
 0x4a8   :  { %v1198_v8 = vpop.eup %1197 }
 0x4a9   :  { %v1200_v10 = vpop.eup %1199  ;;  %v472_v11 = vmul.f32 %v1198_v8, %v464_v37  ;;  %v743_v12 = vpop.permute.xlu1 %742 }
 0x4aa   :  { %v697_v14 = vmul.f32 %v1200_v10, %v690_v5  ;;  %v745_v15 = vadd.f32 %v743_v12, %v1303_v7 }
 0x4ab   :  { %v473_v17 = vmul.f32 %v472_v11, %v456_v9 }
 0x4ac   :  { %1201 = vrcp.f32 %v697_v14  ;;  %747 = vrot.lane.b32.xlu1 %v745_v15, %s1260_s15 }
 0x4ad   :  { %v474_v18 = vadd.f32 %v473_v17, %v457_v16  ;;  %v1532_v29 = vpop.permute.xlu1 %708 }
 0x4af   :  { %v475_v19 = vadd.f32 %v474_v18, %v1429_v13  ;;  %v1168_v13 = vpack.c.bf16 %v561_v23, %v560_v22  ;;  %v483_v22 = vld [vmem:[%s1653_s1 + $0x148] sm:$0x1] }
 0x4b1   :  { %vm476_vm9 = vcmp.gt.f32.partialorder %v475_v19, 0.0  ;;  %v477_v20 = vmul.f32 0.01, %v475_v19  ;;  %1169 = vmatpush3.bf16.msra.mxu1 %v1168_v13 }
 0x4b2   :  { %1170 = vmatprep.subr.bf16.mxu1 %v1251_v3 }
 0x4b3   :  { %v1517_v21 = vsel %vm476_vm9, %v475_v19, %v477_v20 }
 0x4b4   :  { %1100 = vmatmul.mubr.msk.f32.vlgmr.msra.gmra.mrb[4].mxu0 %vm301_vm5, %v1517_v21 }
 0x4b5   :  { %1172 = vmatpush3.bf16.msra.mxu1 %v1171_v55 }
 0x4b6   :  { %v1202_v25 = vpop.eup %1201 }
 0x4b7   :  { %v699_v26 = vmul.f32 %v1202_v25, %v1528_v24 }
 0x4b9   :  { %1203 = vrsqrt.f32 %v699_v26  ;;  %vm702_vm11 = vcmp.eq.f32.partialorder %v699_v26, inf  ;;  %v705_v6 = vand.u32 2147483648, %v699_v26  ;;  %vm704_vm12 = vcmp.eq.f32.partialorder %v699_v26, 0.0 }
 0x4c3   :  { %v1204_v27 = vpop.eup %1203 }
 0x4c4   :  { %v701_v28 = vmul.f32 %v1204_v27, %v699_v26 }
 0x4c6   :  { %v703_v30 = vsel %vm702_vm11, %v699_v26, %v701_v28 }
 0x4c7   :  { %v1534_v31 = vsel %vm704_vm12, %v705_v6, %v703_v30 }
 0x4c8   :  { %v711_v32 = vmul.f32 %v1532_v29, %v1534_v31  ;;  %v707_v44 = vmul.f32 0.35355338, %v1534_v31 }
 0x4ca   :  { %v712_v33 = vmul.f32 1.442695, %v711_v32  ;;  %v717_v48 = vmul.f32 %v1547_v46, %v707_v44 }
 0x4cc   :  { %1205 = vpow2.f32 %v712_v33  ;;  %v718_v50 = vmul.f32 1.442695, %v717_v48 }
 0x4d6   :  { %v1206_v34 = vpop.eup %1205 }
 0x4d7   :  { %1207 = vrcp.f32 %v1206_v34 }
 0x4d8   :  { %1209 = vpow2.f32 %v718_v50 }
 0x4e1   :  { %v1208_v35 = vpop.eup %1207 }
 0x4e2   :  { %v726_v3 = vsub.f32 %v1206_v34, %v1208_v35  ;;  %v724_v36 = vadd.f32 %v1208_v35, %v1206_v34  ;;  %v1210_v52 = vpop.eup %1209 }
 0x4e3   :  { %1211 = vrcp.f32 %v1210_v52 }
 0x4e4   :  { %v1538_v37 = vmul.f32 0.5, %v726_v3  ;;  %v725_v39 = vmul.f32 0.5, %v724_v36 }
 0x4e6   :  { %v1541_v40 = vmul.f32 2.0, %v1538_v37  ;;  %v732_v61 = vmul.f32 %v725_v39, %v707_v44  ;;  %v734_v62 = vmul.f32 %v1538_v37, %v1534_v31  ;;  %v737_v63 = vmul.f32 %v725_v39, %v1534_v31 }
 0x4e7   :  { %v739_v2 = vmul.f32 %v1538_v37, %v707_v44 }
 0x4e8   :  { %v1544_v43 = vmul.f32 %v1541_v40, %v725_v39 }
 0x4ed   :  { %v1212_v56 = vpop.eup %1211 }
 0x4ee   :  { %v728_v57 = vadd.f32 %v1212_v56, %v1210_v52  ;;  %v730_v58 = vsub.f32 %v1210_v52, %v1212_v56  ;;  %v787_v56 = vmul.f32 %v1541_v40, %v1538_v37 }
 0x4f0   :  { %v729_v59 = vmul.f32 0.5, %v728_v57  ;;  %v731_v60 = vmul.f32 0.5, %v730_v58 }
 0x4f2   :  { %v733_v5 = vmul.f32 %v732_v61, %v729_v59  ;;  %v735_v8 = vmul.f32 %v734_v62, %v731_v60  ;;  %v738_v9 = vmul.f32 %v737_v63, %v731_v60  ;;  %v740_v10 = vmul.f32 %v739_v2, %v729_v59 }
 0x4f3   :  { %v757_v19 = vmul.f32 %v729_v59, %v707_v44  ;;  %v564_v44 = vld [vmem:[%s1653_s1 + $0x149] sm:$0x1]  ;;  %v291_v59 = vmax.f32 %v1457_v38, 2.82 }
 0x4f4   :  { %v736_v12 = vadd.f32 %v735_v8, %v733_v5  ;;  %v741_v16 = vadd.f32 %v740_v10, %v738_v9 }
 0x4f5   :  { %v292_v62 = vmin.f32 %v291_v59, 8.46 }
 0x4f6   :  { %v758_v20 = vsub.f32 %v736_v12, %v757_v19 }
 0x4f7   :  { %v669_v8 = vmul.f32 100.0, %v292_v62 }
 0x51e   :  { %v748_v11 = vpop.permute.xlu1 %747 }
 0x51f   :  { %v750_v14 = vmul.f32 %v748_v11, %v1534_v31 }
 0x521   :  { %v751_v15 = vmul.f32 %v750_v14, %v736_v12 }
 0x523   :  { %v752_v17 = vsub.f32 %v741_v16, %v751_v15 }
 0x525   :  { %v764_v18 = vmul.f32 2.0, %v752_v17 }
 0x527   :  { %766 = vrot.lane.b32.xlu1 %v764_v18, %s1261_s27 }
 0x52b   :  { %753 = vrot.lane.b32.xlu1 %v1303_v7, %s1262_s28 }
 0x52f   :  { %760 = vrot.lane.b32.xlu1 %v758_v20, %s1261_s27 }
 0x533   :  { %824 = vrot.lane.b32.xlu1 %v1303_v7, %s1263_s29 }
 0x587   :  { %v553_v23 = vpop.f32.mrb[4].mxu0 }
 0x588   :  { %v554_v13 = vadd.f32 %v553_v23, %v483_v22  ;;  %v1101_v25 = vpop.f32.mrb[5].mxu0  ;;  %v839_v22 = vmul.f32 %v1469_v49, %v671_v47 }
 0x58a   :  { %vm557_vm13 = vcmp.gt.f32.partialorder %v554_v13, 0.0  ;;  %v558_v26 = vmul.f32 0.01, %v554_v13 }
 0x58c   :  { %v559_v27 = vsel %vm557_vm13, %v554_v13, %v558_v26  ;;  %v1268_v26 = vmov 1966171168  }
 0x58d   :  { %1111 = vmatmul.mubr.msk.f32.vlgmr.msra.gmra.mrb[6].mxu1 %vm301_vm5, %v559_v27  ;;  %v894_v27 = vunpack.c.l.s4 %v1268_v26 }
 0x58f   :  { %v895_v47 = vunpack.c.0.s8 %v894_v27 }
 0x599   :  { %v767_v28 = vpop.permute.xlu1 %766 }
 0x59a   :  { %1213 = vrcp.f32 %v767_v28 }
 0x59d   :  { %v754_v6 = vpop.permute.xlu1 %753 }
 0x59e   :  { %v756_v30 = vadd.f32 %v754_v6, %v1303_v7 }
 0x5a0   :  { %v771_v60 = vsub.f32 0.0, %v756_v30 }
 0x5a1   :  { %v761_v32 = vpop.permute.xlu1 %760 }
 0x5a2   :  { %v763_v33 = vmul.f32 %v761_v32, %v756_v30  ;;  %v772_v2 = vmul.f32 0.5, %v771_v60 }
 0x5a4   :  { %v1214_v34 = vpop.eup %1213 }
 0x5a5   :  { %v770_v35 = vmul.f32 %v1214_v34, %v763_v33  ;;  %v825_v3 = vpop.permute.xlu1 %824  ;;  %v898_v34 = vsub.s32 %v895_v47, %v1385_v41  ;;  %v638_v41 = vld [vmem:[%s1653_s1 + $0x14a] sm:$0x1] }
 0x5a6   :  { %v827_v36 = vmul.f32 %v825_v3, %v1303_v7 }
 0x5a7   :  { %774 = vrot.lane.b32.xlu1 %v770_v35, %s1257_s4  ;;  %v784_v12 = vmul.f32 %v770_v35, %v770_v35 }
 0x5a8   :  { %1215 = vrcp.f32 %v827_v36  ;;  %v1607_v36 = vld [vmem:[%s1653_s1 + $0x14e] sm:$0x1] }
 0x5b2   :  { %v1216_v39 = vpop.eup %1215 }
 0x5b3   :  { %830 = vrot.lane.b32.xlu1 %v1216_v39, %s1258_s5  ;;  %v871_v25 = vrot.slane %v1216_v39, %v1388_v42 }
 0x5b7   :  { %883 = vrot.lane.b32.xlu1 %v1477_v51, %s1264_s7 }
 0x619   :  { %v775_v54 = vpop.permute.xlu1 %774 }
 0x61a   :  { %v777_v55 = vmul.f32 %v775_v54, %v750_v14 }
 0x625   :  { %v831_v57 = vpop.permute.xlu1 %830 }
 0x626   :  { %v833_v58 = vmul.f32 %v831_v57, %v1528_v24 }
 0x629   :  { %v884_v5 = vpop.permute.xlu1 %883 }
 0x62a   :  { %v886_v40 = vmul.f32 %v884_v5, %v669_v8 }
 0x660   :  { %v634_v48 = vpop.f32.mrb[6].mxu1 }
 0x661   :  { %v635_v50 = vadd.f32 %v634_v48, %v564_v44  ;;  %v1112_v52 = vpop.f32.mrb[7].mxu1  ;;  %v925_v48 = vrot.slane %v1607_v36, %v898_v34 }
 0x663   :  { %v640_v53 = vsel %vm458_vm7, %v635_v50, 0.0  ;;  %v932_v54 = vrot.slane %v925_v48, %v898_v34 }
 0x664   :  { %641 = vadd.xlane.f32.xlu0 %v640_v53  ;;  %v639_v53 = vld [vmem:[%s1653_s1 + $0x14b] sm:$0x1] }
 0x67a   :  { %779 = vrot.lane.b32.xlu0 %v777_v55, %s1261_s27 }
 0x67e   :  { %887 = vrot.lane.b32.xlu0 %v1477_v51, %s1265_s10 }
 0x682   :  { %801 = vrot.lane.b32.xlu0 %v1544_v43, %s1261_s27 }
 0x686   :  { %813 = vrot.lane.b32.xlu0 %v787_v56, %s1261_s27 }
 0x68a   :  { %851 = vrot.lane.b32.xlu0 %v833_v58, %s1266_s11  ;;  %v660_v58 = vld [vmem:[%s1653_s1 + $0x14c] sm:$0x1]  ;;  %s1269_s1 = smov [#allocation2]  }
 0x6f1   :  { %v642_v61 = vpop.xlane.xlu0 %641 }
 0x6f2   :  { %v643_v63 = vmul.f32 0.03125, %v642_v61 }
 0x6f4   :  { %v644_v51 = vsub.f32 %v635_v50, %v643_v63  ;;  %v791_v63 = vmul.f32 2.0, %v1534_v31 }
 0x6f5   :  { %v780_v43 = vpop.permute.xlu0 %779 }
 0x6f6   :  { %v782_v9 = vsub.f32 %v772_v2, %v780_v43  ;;  %v645_v37 = vmul.f32 %v644_v51, %v644_v51  ;;  %v792_v2 = vmul.f32 %v791_v63, %v1532_v29  ;;  %v788_v43 = vmul.f32 %v1534_v31, %v1534_v31 }
 0x6f8   :  { %v783_v10 = vmul.f32 %v782_v9, %v782_v9  ;;  %v646_v11 = vsel %vm458_vm7, %v645_v37, 0.0  ;;  %v810_v16 = vmul.f32 2.0, %v782_v9  ;;  %v789_v9 = vmul.f32 %v788_v43, %v1534_v31 }
 0x6f9   :  { %647 = vadd.xlane.f32.xlu1 %v646_v11  ;;  %v888_v14 = vpop.permute.xlu0 %887  ;;  %v836_v11 = vmul.f32 %v1500_v1, %v1500_v1  ;;  %v866_v31 = vmul.f32 %v1528_v24, %v1528_v24 }
 0x6fa   :  { %v890_v15 = vmul.f32 %v888_v14, %v886_v40  ;;  %v793_v38 = vsub.f32 %v783_v10, %v784_v12  ;;  %v811_v18 = vmul.f32 %v810_v16, %v770_v35  ;;  %v799_v23 = vadd.f32 %v784_v12, %v783_v10 }
 0x6fb   :  { %v790_v10 = vmul.f32 0.25, %v789_v9  ;;  %v837_v29 = vmul.f32 %v836_v11, %v1498_v0  ;;  %v867_v0 = vmul.f32 %v866_v31, %v1547_v46 }
 0x6fc   :  { %795 = vrot.lane.b32.xlu0 %v793_v38, %s1257_s4  ;;  %1217 = vrcp.f32 %v890_v15 }
 0x6fd   :  { %v802_v17 = vpop.permute.xlu0 %801 }
 0x6fe   :  { %v804_v13 = vmul.f32 %v802_v17, %v799_v23 }
 0x701   :  { %v814_v19 = vpop.permute.xlu0 %813 }
 0x702   :  { %v816_v20 = vmul.f32 %v814_v19, %v811_v18 }
 0x704   :  { %818 = vrot.lane.b32.xlu0 %v816_v20, %s1257_s4 }
 0x705   :  { %v852_v32 = vpop.permute.xlu0 %851 }
 0x706   :  { %v1218_v35 = vpop.eup %1217 }
 0x707   :  { %v899_v44 = vrot.slane %v1218_v35, %v898_v34 }
 0x70a   :  { %846 = vrot.lane.b32.xlu1 %v1303_v7, %s1267_s12 }
 0x70e   :  { %841 = vrot.lane.b32.xlu1 %v839_v22, %s1256_s3 }
 0x712   :  { %806 = vrot.lane.b32.xlu1 %v804_v13, %s1257_s4 }
 0x716   :  { %872 = vrot.lane.b32.xlu1 %v871_v25, %s1258_s5 }
 0x71a   :  { %878 = vrot.lane.b32.xlu1 %v1303_v7, %s1265_s10 }
 0x786   :  { %v648_v28 = vpop.xlane.xlu1 %647 }
 0x787   :  { %v649_v45 = vmul.f32 0.03125, %v648_v28 }
 0x789   :  { %v650_v6 = vadd.f32 1e-05, %v649_v45 }
 0x78a   :  { %v847_v49 = vpop.permute.xlu1 %846 }
 0x78b   :  { %1219 = vrsqrt.f32 %v650_v6  ;;  %v849_v30 = vmul.f32 %v847_v49, %v1303_v7  ;;  %v906_v7 = vrot.slane %v899_v44, %v898_v34 }
 0x78c   :  { %1221 = vrcp.f32 %v1500_v1 }
 0x78d   :  { %v854_v33 = vmul.f32 %v852_v32, %v849_v30 }
 0x78e   :  { %v842_v62 = vpop.permute.xlu1 %841 }
 0x78f   :  { %v855_v3 = vmul.f32 %v854_v33, %v852_v32  ;;  %1223 = vrcp.f32 %v842_v62 }
 0x791   :  { %v860_v39 = vrot.slane %v855_v3, %v1388_v42 }
 0x793   :  { %861 = vrot.lane.b32.xlu0 %v860_v39, %s1260_s15 }
 0x795   :  { %v1220_v50 = vpop.eup %1219 }
 0x796   :  { %v652_v52 = vmul.f32 %v1220_v50, %v644_v51  ;;  %v796_v51 = vpop.permute.xlu0 %795  ;;  %v1222_v14 = vpop.eup %1221 }
 0x797   :  { %907 = vrot.lane.b32.xlu0 %v906_v7, %s1263_s29  ;;  %v798_v5 = vmul.f32 %v796_v51, %v792_v2  ;;  %v834_v18 = vmul.f32 0.5, %v1222_v14 }
 0x798   :  { %v653_v42 = vmul.f32 %v652_v52, %v638_v41 }
 0x799   :  { %v1224_v16 = vpop.eup %1223  ;;  %v835_v23 = vmul.f32 %v834_v18, %v1504_v4 }
 0x79a   :  { %v654_v55 = vadd.f32 %v653_v42, %v639_v53  ;;  %v819_v37 = vpop.permute.xlu0 %818 }
 0x79b   :  { %933 = vrot.lane.b32.xlu0 %v932_v54, %s1256_s3  ;;  %s950_s3 = sshll.u32 %s1269_s1, 4  ;;  %s951_s3 = int_to_ptr.vmem [resolvable:$true] %s950_s3 }
 0x79c   :  { %v655_v56 = vadd.f32 %v654_v55, %v1517_v21  ;;  %v807_v21 = vpop.permute.xlu1 %806  ;;  %s1227_s19 = scalar_lea.vmem %s951_s3, 16  ;;  %s1231_s20 = scalar_lea.vmem %s951_s3, 32 }
 0x79d   :  { %v809_v8 = vadd.f32 %v807_v21, %v798_v5  ;;  %p1228_p0 = scmp.ne.s32.totalorder %s951_s3, %s1227_s19  ;;  %p1232_p1 = scmp.lt.s32.totalorder %s951_s3, %s951_s3 }
 0x79e   :  { %vm656_vm14 = vcmp.gt.f32.partialorder %v655_v56, 0.0  ;;  %v657_v57 = vmul.f32 0.01, %v655_v56  ;;  %p1233_p2 = scmp.lt.s32.totalorder %s1231_s20, %s1227_s19 }
 0x79f   :  { %937 = vrot.lane.b32.xlu0 %v932_v54, %s1263_s29  ;;  %v821_v40 = vadd.f32 %v819_v37, %v809_v8 }
 0x7a0   :  { %v658_v59 = vsel %vm656_vm14, %v655_v56, %v657_v57  ;;  %v873_v15 = vpop.permute.xlu1 %872  ;;  %p1234_p3 = por %p1233_p2, %p1232_p1 }
 0x7a1   :  { %v661_v60 = vmul.f32 %v660_v58, %v658_v59  ;;  %v822_v12 = vmul.f32 %v821_v40, %v790_v10  ;;  %v875_v17 = vmul.f32 %v1222_v14, %v873_v15 }
 0x7a2   :  { %p1235_p4 = pnand %p1234_p3, %p1228_p0 }
 0x7a3   :  { %v662_v61 = vsel %vm458_vm7, %v661_v60, 0.0  ;;  %v838_v38 = vmul.f32 %v837_v29, %v822_v12  ;;  %v876_v25 = vmul.f32 0.33333334, %v875_v17 }
 0x7a4   :  { %663 = vadd.xlane.f32.xlu1 %v662_v61  ;;  %v879_v19 = vpop.permute.xlu1 %878 }
 0x7a5   :  { %v845_v20 = vmul.f32 %v1224_v16, %v838_v38  ;;  %v881_v1 = vmul.f32 %v879_v19, %v866_v31  ;;  %v877_v28 = vmul.f32 %v876_v25, %v867_v0 }
 0x7a7   :  { %v882_v45 = vmul.f32 0.25, %v881_v1 }
 0x805   :  { %v862_v22 = vpop.permute.xlu0 %861 }
 0x806   :  { %v864_v13 = vadd.f32 %v862_v22, %v845_v20 }
 0x808   :  { %v865_v26 = vmul.f32 %v864_v13, %v835_v23 }
 0x809   :  { %v908_v27 = vpop.permute.xlu0 %907 }
 0x80a   :  { %v912_v6 = vadd.f32 %v877_v28, %v865_v26  ;;  %v910_v47 = vmul.f32 %v908_v27, %v882_v45 }
 0x80c   :  { %v913_v49 = vmul.f32 4.0, %v912_v6  ;;  %v911_v30 = vmul.f32 2.0, %v910_v47 }
 0x80d   :  { %v934_v34 = vpop.permute.xlu0 %933 }
 0x80e   :  { %v914_v32 = vadd.f32 %v913_v49, %v911_v30 }
 0x810   :  { %1225 = vrcp.f32 %v914_v32 }
 0x811   :  { %v938_v3 = vpop.permute.xlu0 %937 }
 0x81a   :  { %v1226_v33 = vpop.eup %1225 }
 0x81b   :  { %v916_v24 = vmul.f32 %v1226_v33, %v866_v31 }
 0x81d   :  { %v917_v35 = vmul.f32 0.00083333335, %v916_v24 }
 0x81f   :  { %v936_v4 = vmul.f32 %v934_v34, %v917_v35 }
 0x821   :  { %v940_v44 = vadd.f32 %v938_v3, %v936_v4 }
 0x831   :  { %v664_v39 = vpop.xlane.xlu1 %663 }
 0x832   :  { %v665_v46 = vadd.f32 %v664_v39, %v1607_v36 }
 0x834   :  { %v941_v48 = vadd.f32 %v940_v44, %v665_v46 }
 0x836   :  { %943 = vst.msk [vmem:[#allocation2] sm:$0x1] %vm942_vm15, %v941_v48 }
 0x837   :  { %1238 = shalt.err (!%p1235_p4)
}
 0x838   :  { %s1239_s0 = scalar_lea.hbm %s1654_s2, 16 }
 0x839   :  { %p1240_p5 = scmp.ne.s32.totalorder %s1654_s2, %s1239_s0  ;;  %p1243_p6 = scmp.lt.u32.totalorder %s1239_s0, %s1654_s2 }
 0x83b   :  { %p1245_p7 = pnand %p1243_p6, %p1240_p5 }
 0x83d   :  { %1248 = shalt.err (!%p1245_p7)
}
 0x83e   :  { %953 = dma.vmem_to_hbm [thread:$0]  %s951_s3, 16, %s1654_s2, [#allocation3]  }
 0x83f   :  { %1249 = dma.done.wait [#allocation3], 16  }
 0x840   :  { %1250 = vsyncadd [#allocation3], 4294967280 }
 0x841   :  { %957 = vsyncpa [#allocation3], 1 }

</bundles_post_ra>
